<compile_context>
chip_gen: v6e
topology: v6e:2x2x1
jax: 0.10.0
libtpu: 0.0.40
codegen_flags: <defaults>
</compile_context>

<pallas_src>
import functools

import jax
import jax.numpy as jnp
from jax.experimental import pallas as pl
from jax.experimental.pallas import tpu as pltpu

RMS_EPS = 1e-6


def _round_up(x, m):
    return (x + m - 1) // m * m


def _nbytes(a):
    return a.size * jnp.dtype(a.dtype).itemsize


def _tpu_generation():
    """Best-effort (vmem_capacity_bytes, tensorcores_per_chip, is_v5, is_v7)."""
    kind = ""
    try:
        kind = jax.devices()[0].device_kind.lower()
    except Exception:
        pass
    is_v7 = "v7" in kind
    is_v5 = "v5" in kind
    is_v6 = "v6" in kind
    vmem = None
    try:
        vmem = getattr(pltpu.get_tpu_info(), "vmem_capacity_bytes", None)
    except Exception:
        vmem = None
    if vmem is None:
        # Conservative default (v7x-sized) when we can't query.
        vmem = (128 << 20) if (is_v5 or is_v6) else (64 << 20)
    n_cores = 2 if is_v7 else (1 if (is_v5 or is_v6) else 2)
    return int(vmem), n_cores, is_v5, is_v7


def _reward_head_kernel(x_ref, w_ref, b_ref, g_ref, wh_ref, bh_ref, o_ref,
                        *scratch, layer_num, mxu_dtype, stream):
    # x_ref:  (TM, D)       row tile of features
    # w_ref:  (L, D, H)     stacked backbone Linear weights (in, out)
    #                       VMEM-resident, or raw HBM ref when stream=True
    # b_ref:  (L, H)        stacked backbone Linear biases (f32)
    # g_ref:  (L, H)        stacked RMSNorm scales (f32)
    # wh_ref: (H, Cp)       head Linear weight (in, out), lane-padded
    # bh_ref: (1, Cp)       head Linear bias, lane-padded (f32)
    # o_ref:  (TM, Cp)      row tile of (padded) output logits
    # scratch (stream only): wbuf (2, D, H) VMEM, sem (2,) DMA semaphores
    if stream:
        wbuf, sem = scratch
        pltpu.make_async_copy(w_ref.at[0], wbuf.at[0], sem.at[0]).start()

    h = x_ref[...].astype(jnp.float32)
    # Static unroll is fine for small layer_num; switch to
    # lax.fori_loop(..., unroll=True) with dynamic weight indexing if it grows > ~4.
    for l in range(layer_num):
        if stream:
            slot = l & 1
            pltpu.make_async_copy(w_ref.at[l], wbuf.at[slot], sem.at[slot]).wait()
            if l + 1 < layer_num:
                pltpu.make_async_copy(w_ref.at[l + 1], wbuf.at[1 - slot],
                                      sem.at[1 - slot]).start()
            w = wbuf[slot]                               # (D, H)
        else:
            w = w_ref[l]                                 # (D, H)
        b = b_ref[pl.ds(l, 1), :].astype(jnp.float32)    # (1, H)
        g = g_ref[pl.ds(l, 1), :].astype(jnp.float32)    # (1, H)
        # MXU matmul (operands optionally bf16, accumulation in f32).
        h = jnp.dot(h.astype(mxu_dtype), w, preferred_element_type=jnp.float32) + b
        # RMSNorm: x * rsqrt(mean(x^2) + eps) * gamma (statistics kept in f32).
        ms = jnp.mean(h * h, axis=-1, keepdims=True)
        h = h * jax.lax.rsqrt(ms + RMS_EPS) * g
        # SiLU activation.
        h = h * jax.nn.sigmoid(h)

    out = jnp.dot(h.astype(mxu_dtype), wh_ref[...], preferred_element_type=jnp.float32)
    out = out + bh_ref[...].astype(jnp.float32)
    o_ref[...] = out.astype(o_ref.dtype)


def reward_head_pallas(feat, w_bb, b_bb, g_bb, w_head, b_head, *,
                       tm=None, mxu_dtype="auto", out_dtype=None,
                       stream_weights=None):
    """feat: (B, S, D) -> logits (B, S, C).

    tm:             row tile; None = pick the biggest (<=1024) that fits the
                    generation-aware VMEM budget.
    mxu_dtype:      matmul-operand dtype. "auto" -> bf16 on v6e/v7x, f32 on v5e.
                    Norm/activation math always stays f32.
    out_dtype:      dtype of the padded kernel output slab; None -> bf16 when the
                    MXU path is bf16 (halves the padded writeback), else feat dtype.
    stream_weights: None = auto (stream when resident weights would not fit),
                    True/False = force.
    """
    B, S, D = feat.shape
    L, D_in, H = w_bb.shape
    assert D_in == D
    C = w_head.shape[1]
    N = B * S

    vmem_cap, n_cores, is_v5, _is_v7 = _tpu_generation()
    # ~48 MiB on v7x (64 MiB physical), ~96 MiB on v5e/v6e (128 MiB physical).
    budget = min((vmem_cap * 3) // 4, 100 * 1024 * 1024)

    # ---- MXU operand dtype (weights cast once in the wrapper) -----------------
    if isinstance(mxu_dtype, str) and mxu_dtype == "auto":
        mxu = jnp.dtype(jnp.float32) if is_v5 else jnp.dtype(jnp.bfloat16)
    elif mxu_dtype is None:
        mxu = jnp.dtype(feat.dtype)
    else:
        mxu = jnp.dtype(mxu_dtype)

    # ---- lane-dense head output: pad C to a multiple of 128 (zeros) -----------
    C_pad = _round_up(max(C, 1), 128)
    w_head_p = jnp.pad(w_head, ((0, 0), (0, C_pad - C))).astype(mxu)
    b_head_p = jnp.pad(b_head.reshape(1, C), ((0, 0), (0, C_pad - C)))
    w_bb = w_bb.astype(mxu)

    if out_dtype is not None:
        out_dt = jnp.dtype(out_dtype)
    elif mxu == jnp.dtype(jnp.bfloat16):
        out_dt = jnp.dtype(jnp.bfloat16)   # halve 16x-padded writeback on bf16 path
    else:
        out_dt = jnp.dtype(feat.dtype)

    in_itemsize = jnp.dtype(feat.dtype).itemsize
    out_itemsize = out_dt.itemsize
    mxu_itemsize = mxu.itemsize

    # ---- resident vs streamed backbone weights ---------------------------------
    resident_w_bytes = L * D * H * mxu_itemsize
    if stream_weights is None:
        stream = resident_w_bytes > (budget * 2) // 5   # > ~40% of budget -> stream
    else:
        stream = bool(stream_weights)

    feat_bufs = 3 if is_v5 else 2   # v5e is the most DMA-exposed chip

    def _footprint(rows, n_feat_bufs):
        fixed = (_nbytes(b_bb) + _nbytes(g_bb) + _nbytes(w_head_p) + _nbytes(b_head_p))
        if stream:
            fixed += 2 * D * H * mxu_itemsize           # double-buffered layer weight
        else:
            fixed += resident_w_bytes                   # resident, single-buffered
        io = (n_feat_bufs * rows * D * in_itemsize      # pipelined feat tiles
              + 2 * rows * C_pad * out_itemsize)        # double-buffered out tiles
        temps = 4 * rows * max(D, H, C_pad) * 4         # f32 activation temporaries
        return fixed + io + temps

    # ---- row tiling: biggest tile that fits the budget -------------------------
    if tm is None:
        tm = 8
        for cand in (1024, 512, 256, 128, 64, 32, 16, 8):
            if _footprint(cand, feat_bufs) <= budget:
                tm = cand
                break
    else:
        tm = max(8, _round_up(int(tm), 8))
    if feat_bufs > 2 and _footprint(tm, feat_bufs) > budget:
        feat_bufs = 2

    tm_eff = min(tm, _round_up(N, 8))
    # Only split small inputs across grid steps when there are >=2 TensorCores.
    if n_cores > 1 and N > 8 and pl.cdiv(N, tm_eff) < n_cores:
        tm_eff = max(8, _round_up(pl.cdiv(N, n_cores), 8))
    N_pad = _round_up(N, tm_eff)
    grid = (N_pad // tm_eff,)

    x2d = feat.reshape(N, D)
    if N_pad != N:
        x2d = jnp.pad(x2d, ((0, N_pad - N), (0, 0)))

    # Accurate footprint + fixed headroom (no 2x fudge), capped by the gen budget.
    vmem_limit = int(min(budget,
                         max(32 * 1024 * 1024,
                             _footprint(tm_eff, feat_bufs) + 8 * 1024 * 1024)))

    invariant = pl.Buffered(1)  # grid-invariant operands: no double buffering
    if feat_bufs != 2:
        feat_spec = pl.BlockSpec((tm_eff, D), lambda i: (i, 0),
                                 pipeline_mode=pl.Buffered(feat_bufs))
    else:
        feat_spec = pl.BlockSpec((tm_eff, D), lambda i: (i, 0))

    if stream:
        # Backbone weights stay in HBM; the kernel double-buffers one layer at a
        # time through VMEM scratch with manual async copies.
        w_spec = pl.BlockSpec(memory_space=pl.ANY)
        scratch_shapes = [pltpu.VMEM((2, D, H), mxu),
                          pltpu.SemaphoreType.DMA((2,))]
    else:
        w_spec = pl.BlockSpec((L, D, H), lambda i: (0, 0, 0), pipeline_mode=invariant)
        scratch_shapes = []

    out2d = pl.pallas_call(
        functools.partial(_reward_head_kernel, layer_num=L, mxu_dtype=mxu,
                          stream=stream),
        out_shape=jax.ShapeDtypeStruct((N_pad, C_pad), out_dt),
        grid_spec=pltpu.PrefetchScalarGridSpec(
            num_scalar_prefetch=0,
            grid=grid,
            in_specs=[
                feat_spec,                                              # feat row tile
                w_spec,                                                 # backbone W
                pl.BlockSpec((L, H), lambda i: (0, 0),
                             pipeline_mode=invariant),                  # backbone b
                pl.BlockSpec((L, H), lambda i: (0, 0),
                             pipeline_mode=invariant),                  # RMSNorm gamma
                pl.BlockSpec((H, C_pad), lambda i: (0, 0),
                             pipeline_mode=invariant),                  # head W (padded)
                pl.BlockSpec((1, C_pad), lambda i: (0, 0),
                             pipeline_mode=invariant),                  # head b (padded)
            ],
            out_specs=pl.BlockSpec((tm_eff, C_pad), lambda i: (i, 0)),
            scratch_shapes=scratch_shapes,
        ),
        compiler_params=pltpu.CompilerParams(
            dimension_semantics=("parallel",),
            vmem_limit_bytes=vmem_limit),
    )(x2d, w_bb, b_bb, g_bb, w_head_p, b_head_p)

    return out2d[:N, :C].astype(feat.dtype).reshape(B, S, C)


def reward_head_reference(feat, w_bb, b_bb, g_bb, w_head, b_head, mxu_dtype=None):
    md = jnp.dtype(mxu_dtype) if mxu_dtype is not None else jnp.dtype(jnp.float32)
    h = feat.astype(jnp.float32)
    L = w_bb.shape[0]
    for l in range(L):
        h = jnp.dot(h.astype(md), w_bb[l].astype(md),
                    preferred_element_type=jnp.float32) + b_bb[l]
        ms = jnp.mean(h * h, axis=-1, keepdims=True)
        h = h * jax.lax.rsqrt(ms + RMS_EPS) * g_bb[l]
        h = h * jax.nn.sigmoid(h)
    out = jnp.dot(h.astype(md), w_head.astype(md),
                  preferred_element_type=jnp.float32) + b_head
    return out.astype(feat.dtype)


if __name__ == "__main__":
    # Small, forward-consistent shapes.
    # NOTE: the PyTorch module uses nn.Linear(inp_dim, hidden_units) for *every*
    # backbone layer, which only composes when inp_dim == hidden_units for
    # layer_num > 1; we mirror that.
    batch, seq = 2, 8
    inp_dim = hidden_units = 32
    num_classes = 8
    layer_num = 2
    # act = "SiLU"

    key = jax.random.PRNGKey(0)
    k_feat, k_w, k_b, k_wh, k_bh = jax.random.split(key, 5)

    feat = jax.random.normal(k_feat, (batch, seq, inp_dim), dtype=jnp.float32)

    # Deterministic parameter init (weights stored as (in, out), i.e. W.T of nn.Linear).
    w_bb = jax.random.normal(k_w, (layer_num, inp_dim, hidden_units),
                             dtype=jnp.float32) * (1.0 / jnp.sqrt(inp_dim))
    b_bb = jax.random.normal(k_b, (layer_num, hidden_units),
                             dtype=jnp.float32) * 0.01
    g_bb = jnp.ones((layer_num, hidden_units), dtype=jnp.float32)  # RMSNorm weight init
    w_head = jax.random.normal(k_wh, (hidden_units, num_classes),
                               dtype=jnp.float32) * (1.0 / jnp.sqrt(hidden_units))
    b_head = jax.random.normal(k_bh, (num_classes,), dtype=jnp.float32) * 0.01

    ref_f32 = reward_head_reference(feat, w_bb, b_bb, g_bb, w_head, b_head)

    # --- f32 path, resident weights (strict check vs pure f32 reference) ------
    out = reward_head_pallas(feat, w_bb, b_bb, g_bb, w_head, b_head,
                             mxu_dtype=jnp.float32, stream_weights=False)
    out = jax.block_until_ready(out)
    assert out.shape == (batch, seq, num_classes)
    assert jnp.allclose(out, ref_f32, atol=1e-4, rtol=1e-4), "f32 mismatch vs reference"

    # --- f32 path, forced weight streaming (exercises the HBM->VMEM DMA path) --
    out_stream = reward_head_pallas(feat, w_bb, b_bb, g_bb, w_head, b_head,
                                    mxu_dtype=jnp.float32, stream_weights=True)
    out_stream = jax.block_until_ready(out_stream)
    assert jnp.allclose(out_stream, ref_f32, atol=1e-4, rtol=1e-4), \
        "streamed-weight mismatch vs reference"

    # --- bf16-MXU path (v6e/v7x fast path; checked vs bf16-aware reference) ----
    out_bf16 = reward_head_pallas(feat, w_bb, b_bb, g_bb, w_head, b_head,
                                  mxu_dtype=jnp.bfloat16)
    out_bf16 = jax.block_until_ready(out_bf16)
    ref_bf16 = reward_head_reference(feat, w_bb, b_bb, g_bb, w_head, b_head,
                                     mxu_dtype=jnp.bfloat16)
    assert jnp.allclose(out_bf16, ref_bf16, atol=2e-2, rtol=2e-2), \
        "bf16 mismatch vs reference"

    print("KERNEL_OK")
</pallas_src>

<mosaic_0001>
module attributes {stable_mosaic.version = 11 : i64} {
  func.func @_reward_head_kernel(%arg0: i32, %arg1: memref<8x32xf32, #tpu.memory_space<vmem>>, %arg2: memref<2x32x32xf32, #tpu.memory_space<vmem>>, %arg3: memref<2x32xf32, #tpu.memory_space<vmem>>, %arg4: memref<2x32xf32, #tpu.memory_space<vmem>>, %arg5: memref<32x128xf32, #tpu.memory_space<vmem>>, %arg6: memref<1x128xf32, #tpu.memory_space<vmem>>, %arg7: memref<8x128xf32, #tpu.memory_space<vmem>>) attributes {dimension_semantics = [#tpu.dimension_semantics<parallel>], iteration_bounds = array<i64: 2>, scalar_prefetch = 0 : i64, scratch_operands = 0 : i64, tpu.core_type = #tpu.core_type<tc>, window_params = [{transform_indices = @transform_0, window_bounds = array<i64: 8, 32>}, {pipeline_mode = #tpu.pipeline_mode<synchronous>, transform_indices = @transform_1, window_bounds = array<i64: 2, 32, 32>}, {pipeline_mode = #tpu.pipeline_mode<synchronous>, transform_indices = @transform_2, window_bounds = array<i64: 2, 32>}, {pipeline_mode = #tpu.pipeline_mode<synchronous>, transform_indices = @transform_3, window_bounds = array<i64: 2, 32>}, {pipeline_mode = #tpu.pipeline_mode<synchronous>, transform_indices = @transform_4, window_bounds = array<i64: 32, 128>}, {pipeline_mode = #tpu.pipeline_mode<synchronous>, transform_indices = @transform_5, window_bounds = array<i64: 1, 128>}, {transform_indices = @transform_6, window_bounds = array<i64: 8, 128>}]} {
    %c0 = arith.constant 0 : index
    %c0_0 = arith.constant 0 : index
    %0 = vector.load %arg1[%c0, %c0_0] : memref<8x32xf32, #tpu.memory_space<vmem>>, vector<8x32xf32>
    %c0_1 = arith.constant 0 : index
    %c0_2 = arith.constant 0 : index
    %c0_3 = arith.constant 0 : index
    %1 = vector.load %arg2[%c0_1, %c0_2, %c0_3] : memref<2x32x32xf32, #tpu.memory_space<vmem>>, vector<1x32x32xf32>
    %2 = vector.shape_cast %1 : vector<1x32x32xf32> to vector<32x32xf32>
    %c0_4 = arith.constant 0 : index
    %c0_5 = arith.constant 0 : index
    %3 = vector.load %arg3[%c0_4, %c0_5] : memref<2x32xf32, #tpu.memory_space<vmem>>, vector<1x32xf32>
    %c0_6 = arith.constant 0 : index
    %c0_7 = arith.constant 0 : index
    %4 = vector.load %arg4[%c0_6, %c0_7] : memref<2x32xf32, #tpu.memory_space<vmem>>, vector<1x32xf32>
    %cst = arith.constant dense<0.000000e+00> : vector<8x32xf32>
    %5 = tpu.matmul %0, %2, %cst {dimension_numbers = #tpu.dot_dimension_numbers<[1], [0], [0], [1], [0, 0, 1, 1], [], []>} : vector<8x32xf32>, vector<32x32xf32>, vector<8x32xf32> -> vector<8x32xf32>
    %6 = vector.broadcast %3 : vector<1x32xf32> to vector<8x32xf32>
    %7 = arith.addf %5, %6 : vector<8x32xf32>
    %8 = arith.mulf %7, %7 : vector<8x32xf32>
    %cst_8 = arith.constant dense<0.000000e+00> : vector<8xf32>
    %9 = vector.multi_reduction <add>, %8, %cst_8 [1] : vector<8x32xf32> to vector<8xf32>
    %10 = vector.shape_cast %9 : vector<8xf32> to vector<8x1xf32>
    %cst_9 = arith.constant 3.200000e+01 : f32
    %11 = vector.broadcast %cst_9 : f32 to vector<8x1xf32>
    %12 = arith.divf %10, %11 : vector<8x1xf32>
    %cst_10 = arith.constant 9.99999997E-7 : f32
    %13 = vector.broadcast %cst_10 : f32 to vector<8x1xf32>
    %14 = arith.addf %12, %13 : vector<8x1xf32>
    %15 = math.rsqrt %14 : vector<8x1xf32>
    %16 = vector.broadcast %15 : vector<8x1xf32> to vector<8x32xf32>
    %17 = arith.mulf %7, %16 : vector<8x32xf32>
    %18 = vector.broadcast %4 : vector<1x32xf32> to vector<8x32xf32>
    %19 = arith.mulf %17, %18 : vector<8x32xf32>
    %20 = arith.negf %19 : vector<8x32xf32>
    %21 = math.exp %20 : vector<8x32xf32>
    %cst_11 = arith.constant 1.000000e+00 : f32
    %22 = vector.broadcast %cst_11 : f32 to vector<8x32xf32>
    %23 = arith.addf %22, %21 : vector<8x32xf32>
    %24 = arith.divf %22, %23 : vector<8x32xf32>
    %25 = arith.mulf %19, %24 : vector<8x32xf32>
    %c1 = arith.constant 1 : index
    %c0_12 = arith.constant 0 : index
    %c0_13 = arith.constant 0 : index
    %26 = vector.load %arg2[%c1, %c0_12, %c0_13] : memref<2x32x32xf32, #tpu.memory_space<vmem>>, vector<1x32x32xf32>
    %27 = vector.shape_cast %26 : vector<1x32x32xf32> to vector<32x32xf32>
    %c1_14 = arith.constant 1 : index
    %c0_15 = arith.constant 0 : index
    %28 = vector.load %arg3[%c1_14, %c0_15] : memref<2x32xf32, #tpu.memory_space<vmem>>, vector<1x32xf32>
    %c1_16 = arith.constant 1 : index
    %c0_17 = arith.constant 0 : index
    %29 = vector.load %arg4[%c1_16, %c0_17] : memref<2x32xf32, #tpu.memory_space<vmem>>, vector<1x32xf32>
    %cst_18 = arith.constant dense<0.000000e+00> : vector<8x32xf32>
    %30 = tpu.matmul %25, %27, %cst_18 {dimension_numbers = #tpu.dot_dimension_numbers<[1], [0], [0], [1], [0, 0, 1, 1], [], []>} : vector<8x32xf32>, vector<32x32xf32>, vector<8x32xf32> -> vector<8x32xf32>
    %31 = vector.broadcast %28 : vector<1x32xf32> to vector<8x32xf32>
    %32 = arith.addf %30, %31 : vector<8x32xf32>
    %33 = arith.mulf %32, %32 : vector<8x32xf32>
    %cst_19 = arith.constant dense<0.000000e+00> : vector<8xf32>
    %34 = vector.multi_reduction <add>, %33, %cst_19 [1] : vector<8x32xf32> to vector<8xf32>
    %35 = vector.shape_cast %34 : vector<8xf32> to vector<8x1xf32>
    %cst_20 = arith.constant 3.200000e+01 : f32
    %36 = vector.broadcast %cst_20 : f32 to vector<8x1xf32>
    %37 = arith.divf %35, %36 : vector<8x1xf32>
    %cst_21 = arith.constant 9.99999997E-7 : f32
    %38 = vector.broadcast %cst_21 : f32 to vector<8x1xf32>
    %39 = arith.addf %37, %38 : vector<8x1xf32>
    %40 = math.rsqrt %39 : vector<8x1xf32>
    %41 = vector.broadcast %40 : vector<8x1xf32> to vector<8x32xf32>
    %42 = arith.mulf %32, %41 : vector<8x32xf32>
    %43 = vector.broadcast %29 : vector<1x32xf32> to vector<8x32xf32>
    %44 = arith.mulf %42, %43 : vector<8x32xf32>
    %45 = arith.negf %44 : vector<8x32xf32>
    %46 = math.exp %45 : vector<8x32xf32>
    %cst_22 = arith.constant 1.000000e+00 : f32
    %47 = vector.broadcast %cst_22 : f32 to vector<8x32xf32>
    %48 = arith.addf %47, %46 : vector<8x32xf32>
    %49 = arith.divf %47, %48 : vector<8x32xf32>
    %50 = arith.mulf %44, %49 : vector<8x32xf32>
    %c0_23 = arith.constant 0 : index
    %c0_24 = arith.constant 0 : index
    %51 = vector.load %arg5[%c0_23, %c0_24] : memref<32x128xf32, #tpu.memory_space<vmem>>, vector<32x128xf32>
    %cst_25 = arith.constant dense<0.000000e+00> : vector<8x128xf32>
    %52 = tpu.matmul %50, %51, %cst_25 {dimension_numbers = #tpu.dot_dimension_numbers<[1], [0], [0], [1], [0, 0, 1, 1], [], []>} : vector<8x32xf32>, vector<32x128xf32>, vector<8x128xf32> -> vector<8x128xf32>
    %c0_26 = arith.constant 0 : index
    %c0_27 = arith.constant 0 : index
    %53 = vector.load %arg6[%c0_26, %c0_27] : memref<1x128xf32, #tpu.memory_space<vmem>>, vector<1x128xf32>
    %54 = vector.broadcast %53 : vector<1x128xf32> to vector<8x128xf32>
    %55 = arith.addf %52, %54 : vector<8x128xf32>
    %c0_28 = arith.constant 0 : index
    %c0_29 = arith.constant 0 : index
    %56 = vector.load %arg7[%c0_28, %c0_29] : memref<8x128xf32, #tpu.memory_space<vmem>>, vector<8x128xf32>
    tpu.vector_store %arg7[%c0_28, %c0_29], %55 {strides = array<i32>} : memref<8x128xf32, #tpu.memory_space<vmem>>, vector<8x128xf32>,
    return
  }
  func.func @transform_0(%arg0: i32) -> (i32, i32) {
    %c0_i32 = arith.constant 0 : i32
    %c0_i32_0 = arith.constant 0 : i32
    return %arg0, %c0_i32 : i32, i32
  }
  func.func @transform_1(%arg0: i32) -> (i32, i32, i32) {
    %c0_i32 = arith.constant 0 : i32
    %c0_i32_0 = arith.constant 0 : i32
    %c0_i32_1 = arith.constant 0 : i32
    %c0_i32_2 = arith.constant 0 : i32
    return %c0_i32, %c0_i32_0, %c0_i32_1 : i32, i32, i32
  }
  func.func @transform_2(%arg0: i32) -> (i32, i32) {
    %c0_i32 = arith.constant 0 : i32
    %c0_i32_0 = arith.constant 0 : i32
    %c0_i32_1 = arith.constant 0 : i32
    return %c0_i32, %c0_i32_0 : i32, i32
  }
  func.func @transform_3(%arg0: i32) -> (i32, i32) {
    %c0_i32 = arith.constant 0 : i32
    %c0_i32_0 = arith.constant 0 : i32
    %c0_i32_1 = arith.constant 0 : i32
    return %c0_i32, %c0_i32_0 : i32, i32
  }
  func.func @transform_4(%arg0: i32) -> (i32, i32) {
    %c0_i32 = arith.constant 0 : i32
    %c0_i32_0 = arith.constant 0 : i32
    %c0_i32_1 = arith.constant 0 : i32
    return %c0_i32, %c0_i32_0 : i32, i32
  }
  func.func @transform_5(%arg0: i32) -> (i32, i32) {
    %c0_i32 = arith.constant 0 : i32
    %c0_i32_0 = arith.constant 0 : i32
    %c0_i32_1 = arith.constant 0 : i32
    return %c0_i32, %c0_i32_0 : i32, i32
  }
  func.func @transform_6(%arg0: i32) -> (i32, i32) {
    %c0_i32 = arith.constant 0 : i32
    %c0_i32_0 = arith.constant 0 : i32
    return %arg0, %c0_i32 : i32, i32
  }
}

</mosaic_0001>

<bundles_post_ra>
// kernel: tpu_custom_call.1
= control target key start
LH: loop header
LB: loop body
LE: loop exit
PB: predicated region body
PF: predicated region fallthrough
CT: control target
= control target key end

     0   :  { %s1257_s0 = inlined_call_operand.hbm [shape: f32[16,32], index: 0, kind: input, shape index: {}]   ;;  %s1258_s1 = inlined_call_operand.hbm [shape: f32[2,32,32], index: 1, kind: input, shape index: {}]   ;;  %s1259_s2 = inlined_call_operand.vmem [shape: f32[2,32], index: 2, kind: input, shape index: {}]   ;;  %s1260_s3 = inlined_call_operand.vmem [shape: f32[2,32], index: 3, kind: input, shape index: {}]   ;;  %s1261_s4 = inlined_call_operand.hbm [shape: f32[32,128], index: 4, kind: input, shape index: {}]   ;;  %s1262_s5 = inlined_call_operand.vmem [shape: f32[1,128], index: 5, kind: input, shape index: {}]   ;;  %s1263_s6 = inlined_call_operand.hbm [shape: f32[16,128], index: 6, kind: output, shape index: {}]  }
   0x1   :  { %1268 = sst [smem:[#allocation12_spill]] %s1258_s1 }
   0x2   :  { %11 = vsyncpa [#allocation3], 0 }
   0x3   :  { %13 = vsyncpa [#allocation3 + $0x1], 0 }
   0x4   :  { %14 = vsyncpa [#allocation6], 0 }
   0x5   :  { %15 = vsyncpa [#allocation4], 0 }
   0x6   :  { %17 = vsyncpa [#allocation4 + $0x1], 0  ;;  %s1044_s21 = smov 0   ;;  %s1046_s22 = smov 0  }
   0x7   :  { %s1048_s23 = smov 0   ;;  %s1050_s24 = smov 0  }
   0x8 LB: > { %s1065_s25 = sadd.s32 4294967295, %s999_s24   ;;  %s694_s26 = sadd.s32 4294967294, %s999_s24   ;;  %s999_s24 = sphi %s1050_s24, %s1287_s24   ;;  %s995_s23 = sphi %s1048_s23, %s1286_s23   ;;  %s991_s22 = sphi %s1046_s22, %s1285_s22   ;;  %s987_s21 = sphi %s1044_s21, %s1284_s21  }
   0x9   : > { %p43_p0 = scmp.ne.s32.totalorder %s991_s22, %s987_s21  ;;  %p1264_p1 = scmp.eq.s32.totalorder %s1065_s25, 0 }
   0xa   : > { %p178_p3 = scmp.eq.s32.totalorder %s694_s26, 1  ;;  %p695_p5 = scmp.ge.s32.totalorder %s999_s24, 1 }
   0xb   : > { %p1074_p4 = por %p1264_p1, %p43_p0  ;;  %p185_p7 = scmp.lt.s32.totalorder %s999_s24, 3 }
   0xc   : > { %p1079_p6 = por %p178_p3, %p43_p0  ;;  %s1001_s30 = smov [#allocation5]  }
   0xd   : > { %s1269_s27 = scalar_select %p1074_p4, 1, 0 }
   0xe   : > { %s1270_s28 = scalar_select %p1079_p6, 1, 0 }
   0xf   : > { %p1084_p8 = pnand %p695_p5, %p185_p7  ;;  %s197_s7 = sshll.u32 %s1001_s30, 4  ;;  %s198_s7 = int_to_ptr.vmem [resolvable:$true] %s197_s7 }
  0x10   : > { %s1002_s9 = smov [#allocation7]   ;;  %s862_s11 = scalar_lea.vmem %s198_s7, 1024 }
  0x11   : > { %s1271_s29 = scalar_select %p1084_p8, 1, 0 }
  0x12   : > { %p780_p9 = pneg %p1084_p8  ;;  %s216_s10 = sshll.u32 %s1002_s9, 4  ;;  %s217_s10 = int_to_ptr.vmem [resolvable:$true] %s216_s10 }
  0x13   : > { %p863_p13 = scmp.ne.s32.totalorder %s198_s7, %s862_s11  ;;  %p870_p5 = scmp.lt.s32.totalorder %s198_s7, %s198_s7 }
  0x14   : > { %p1093_p11 = pnand %p780_p9, %p1264_p1  ;;  %p871_p7 = scmp.lt.s32.totalorder %s862_s11, %s862_s11 }
  0x16   : > { %p853_p12 = pneg %p1093_p11  ;;  %p872_p10 = por %p871_p7, %p870_p5 }
  0x18   : > { %p865_p0 = pnand %p863_p13, %p853_p12 }
  0x1a   : > { %p866_p3 = pneg %p865_p0 }
  0x1c   : > { %p873_p9 = pnand %p872_p10, %p866_p3 }
  0x1e   : > { %876 = shalt.err (!%p873_p9)
}
  0x1f   : > { %s1003_s12 = smov 128   ;;  %s1004_s13 = smov 8  }
  0x20   : > { %s1273_s1 = sld [smem:[#allocation12_spill]]  ;;  %s888_s16 = scalar_lea.vmem %s217_s10, 512 }
  0x21   : > { %p889_p1 = scmp.ne.s32.totalorder %s217_s10, %s888_s16  ;;  %p896_p2 = scmp.lt.s32.totalorder %s217_s10, %s217_s10 }
  0x22   : > { %p897_p6 = scmp.lt.s32.totalorder %s888_s16, %s888_s16 }
  0x23   : > { %p891_p13 = pnand %p889_p1, %p853_p12 }
  0x24   : > { %p898_p5 = por %p897_p6, %p896_p2 }
  0x25   : > { %p892_p0 = pneg %p891_p13 }
  0x26   : > { %783 = dma.hbm_to_vmem [thread:$0]  (!%p1093_p11), %s1273_s1, 1024, %s198_s7, [#allocation6], %s1003_s12, %s1003_s12, %s1004_s13  }
  0x27   : > { %p899_p10 = pnand %p898_p5, %p892_p0 }
  0x29   : > { %902 = shalt.err (!%p899_p10)
}
  0x2a   : > { %786 = dma.hbm_to_vmem [thread:$0]  (!%p1093_p11), %s1261_s4, 512, %s217_s10, [#allocation6], %s1003_s12, %s1003_s12, %s1004_s13  }
  0x2b   : > { %s1116_s19 = sadd.s32 1, %s999_s24   ;;  %s30_s20 = sadd.s32 1, %s995_s23 }
  0x2c   : > { %s27_s26 = ssub.s32 %s999_s24, %s1116_s19  ;;  %p37_p1 = scmp.ne.s32.totalorder %s995_s23, %s991_s22 }
  0x2d   : > { %p28_p2 = scmp.eq.s32.totalorder %s27_s26, 0  ;;  %p38_p6 = scmp.eq.s32.totalorder %s999_s24, 0 }
  0x2e   : > { %p1274_p12 = scmp.eq.s32.totalorder %s1065_s25, 1  ;;  %p797_p7 = scmp.lt.s32.totalorder %s999_s24, 2 }
  0x2f   : > { %s1132_s7 = scalar_select %p28_p2, %s995_s23, %s30_s20  }
  0x30   : > { %p1126_p3 = por %p1274_p12, %p37_p1  ;;  %p39_p9 = por %p38_p6, %p37_p1 }
  0x31   : > { %s233_s8 = sand.u32 1, %s995_s23   ;;  %s700_s10 = sshll.u32 %s999_s24, 7 }
  0x32   : > { %s1275_s30 = scalar_select %p1126_p3, 1, 0 }
  0x33   : > { %s699_s9 = sshll.u32 %s233_s8, 3  ;;  %s1139_s13 = scalar_lea.hbm %s1257_s0, %s700_s10 }
  0x34   : > { %s237_s14 = scalar_lea.vmem [#allocation2], %s699_s9  ;;  %p1141_p11 = pnand %p797_p7, %p39_p9 }
  0x35   : > { %s244_s15 = sshll.u32 %s237_s14, 4  ;;  %s234_s17 = scalar_lea.sflag [#allocation3], %s233_s8  ;;  %s245_s15 = int_to_ptr.vmem [resolvable:$true] %s244_s15 }
  0x36   : > { %s903_s18 = scalar_lea.hbm %s1139_s13, 128  ;;  %p905_p0 = pneg %p1141_p11 }
  0x37   : > { %p904_p13 = scmp.ne.s32.totalorder %s1139_s13, %s903_s18  ;;  %s908_s10 = scalar_lea.hbm %s1257_s0, 256 }
  0x38   : > { %p909_p1 = scmp.lt.s32.totalorder %s1139_s13, %s1257_s0  ;;  %p910_p2 = scmp.lt.s32.totalorder %s908_s10, %s903_s18 }
  0x39   : > { %p906_p5 = pnand %p905_p0, %p904_p13 }
  0x3a   : > { %p911_p6 = por %p910_p2, %p909_p1 }
  0x3b   : > { %p907_p10 = pneg %p906_p5 }
  0x3d   : > { %p912_p12 = pnand %p911_p6, %p907_p10 }
  0x3f   : > { %915 = shalt.err (!%p912_p12)
}
  0x40   : > { %s916_s12 = scalar_lea.vmem %s245_s15, 128  ;;  %s1005_s8 = smov [#allocation2]  }
  0x41   : > { %p917_p7 = scmp.ne.s32.totalorder %s245_s15, %s916_s12  ;;  %s921_s14 = sshll.u32 %s1005_s8, 4  ;;  %s922_s14 = int_to_ptr.vmem [resolvable:$false] %s921_s14 }
  0x42   : > { %s923_s1 = scalar_lea.vmem %s922_s14, 256  ;;  %p924_p13 = scmp.lt.s32.totalorder %s245_s15, %s922_s14 }
  0x43   : > { %p919_p9 = pnand %p917_p7, %p905_p0  ;;  %p925_p5 = scmp.lt.s32.totalorder %s923_s1, %s916_s12 }
  0x45   : > { %p920_p3 = pneg %p919_p9  ;;  %p926_p4 = por %p925_p5, %p924_p13 }
  0x47   : > { %p927_p8 = pnand %p926_p4, %p920_p3 }
  0x49   : > { %930 = shalt.err (!%p927_p8)
}
  0x4a   : > { %790 = dma.hbm_to_vmem [thread:$0]  (!%p1141_p11), %s1139_s13, 128, %s245_s15, %s234_s17  }
  0x4b   : > { %p1277_p10 = scmp.ne.s32.totalorder %s1271_s29, 0 }
  0x4c   : > { %s1162_s18 = sand.u32 (!%p1277_p10), 1, %s991_s22   ;;  %p1278_p4 = scmp.ne.s32.totalorder (!%p1277_p10), %s1269_s27, 0 }
  0x4d   : > { %253 = sbr.rel (%p1277_p10) target bundleno = 1088 (0x440), region = 44  ;;  %s702_s20 = sshll.u32 (!%p1277_p10), %s1162_s18, 3 }
  0x4e   : > { %s256_s26 = scalar_lea.sflag (!%p1277_p10), [#allocation3], %s1162_s18  ;;  %s259_s1 = scalar_lea.vmem (!%p1277_p10), [#allocation2], %s702_s20 }
  0x52   : > { %974 = dma.done.wait (%p1278_p4), %s256_s26, 128  }
  0x53   : > { %976 = vsyncadd (%p1278_p4), %s256_s26, 4294967168  ;;  %p1279_p8 = scmp.eq.s32.totalorder %s1065_s25, 0 }
  0x55   : > { %978 = dma.done.wait (%p1279_p8), [#allocation6], 1536   ;;  %p1280_p3 = pmov %p1279_p8 }
  0x56   : > { %v1006_v0 = vmov 0.0   ;;  %vm1007_vm0 = vmmov 0   ;;  %v300_v1 = vld [vmem:[#allocation5 + $0x18] sm:$0xff]  ;;  %v299_v2 = vld [vmem:[#allocation5 + $0x10] sm:$0xff]  ;;  %v298_v3 = vld [vmem:[#allocation5 + $0x8] sm:$0xff]  ;;  %vm307_vm1 = vcmask 261120  }
  0x57   : > { %980 = vsyncadd (%p1280_p3), [#allocation6], 4294965760  ;;  %735 = vmatprep.subr.mxu0 %v1006_v0  ;;  %743 = vmatprep.mubr.msk.f32.mxu0 %vm1007_vm0, %v1006_v0  ;;  %v297_v4 = vld [vmem:[#allocation5] sm:$0xff]  ;;  %v296_v5 = vld [vmem:[%s259_s1] sm:$0xff]  ;;  %s717_s8 = sshll.u32 %s1065_s25, 7  ;;  %s295_s14 = scalar_lea.vmem [#allocation8], %s702_s20 }
  0x58   : > { %746 = vmatprep.subr.mxu1 %v1006_v0  ;;  %754 = vmatprep.mubr.msk.f32.mxu1 %vm1007_vm0, %v1006_v0  ;;  %v706_v6 = vld [vmem:[%s1259_s2] ss:$0 sm:$0xff]  ;;  %v406_v12 = vld [vmem:[#allocation5 + $0x38] sm:$0xff]  ;;  %v404_v14 = vld [vmem:[#allocation5 + $0x28] sm:$0xff]  ;;  %s605_s26 = sshll.u32 %s295_s14, 4  ;;  %s1220_s29 = scalar_lea.hbm %s1263_s6, %s717_s8  ;;  %s606_s26 = int_to_ptr.vmem [resolvable:$true] %s605_s26 }
  0x59   : > { %736 = vmatpush3.msra.mxu0 %v300_v1  ;;  %v405_v13 = vld [vmem:[#allocation5 + $0x30] sm:$0xff]  ;;  %747 = vmatpush3.msra.mxu1 %v406_v12  ;;  %v403_v15 = vld [vmem:[#allocation5 + $0x20] sm:$0xff]  ;;  %v509_v34 = vld [vmem:[#allocation7 + $0x18] sm:$0xff]  ;;  %s592_s13 = scalar_lea.sflag [#allocation4], %s1162_s18  ;;  %s931_s15 = scalar_lea.vmem %s606_s26, 128 }
  0x5a   : > { %737 = vmatprep.subr.mxu0 %v1006_v0  ;;  %748 = vmatprep.subr.mxu1 %v1006_v0  ;;  %v708_v20 = vld [vmem:[%s1260_s3] ss:$0 sm:$0xff]  ;;  %v710_v28 = vld [vmem:[%s1259_s2 + $0x1] ss:$0 sm:$0xff]  ;;  %v507_v36 = vld [vmem:[#allocation7 + $0x8] sm:$0xff]  ;;  %p932_p11 = scmp.ne.s32.totalorder %s606_s26, %s931_s15  ;;  %p1281_p0 = scmp.ne.s32.totalorder %s1275_s30, 0 }
  0x5b   : > { %738 = vmatpush3.msra.mxu0 %v299_v2  ;;  %749 = vmatpush3.msra.mxu1 %v405_v13  ;;  %v508_v35 = vld [vmem:[#allocation7 + $0x10] sm:$0xff]  ;;  %v506_v37 = vld [vmem:[#allocation7] sm:$0xff]  ;;  %s1008_s25 = smov [#allocation8]  }
  0x5c   : > { %739 = vmatprep.subr.mxu0 %v1006_v0  ;;  %750 = vmatprep.subr.mxu1 %v1006_v0  ;;  %v712_v42 = vld [vmem:[%s1260_s3 + $0x1] ss:$0 sm:$0xff]  ;;  %v714_v50 = vld [vmem:[%s1262_s5] ss:$0 sm:$0xff]  ;;  %p933_p1 = pnand %p932_p11, %p1281_p0  ;;  %s935_s16 = sshll.u32 %s1008_s25, 4  ;;  %s936_s16 = int_to_ptr.vmem [resolvable:$false] %s935_s16 }
  0x5d   : > { %740 = vmatpush3.msra.mxu0 %v298_v3  ;;  %751 = vmatpush3.msra.mxu1 %v404_v14  ;;  %s937_s20 = scalar_lea.vmem %s936_s16, 256  ;;  %p938_p6 = scmp.lt.s32.totalorder %s606_s26, %s936_s16 }
  0x5e   : > { %741 = vmatprep.subr.mxu0 %v1006_v0  ;;  %752 = vmatprep.subr.mxu1 %v1006_v0  ;;  %p934_p2 = pneg %p933_p1  ;;  %p939_p12 = scmp.lt.s32.totalorder %s937_s20, %s931_s15 }
  0x5f   : > { %742 = vmatpush3.msra.mxu0 %v297_v4  ;;  %753 = vmatpush3.msra.mxu1 %v403_v15 }
  0x60   : > { %744 = vmatmul.mubr.msk.f32.vlgmr.msra.gmra.mxu0 %vm307_vm1, %v296_v5  ;;  %757 = vmatprep.subr.mxu0 %v1006_v0  ;;  %p940_p7 = por %p939_p12, %p938_p6 }
  0x61   : > { %765 = vmatprep.mubr.msk.f32.mxu0 %vm1007_vm0, %v1006_v0  ;;  %758 = vmatpush3.msra.mxu0 %v509_v34 }
  0x62   : > { %759 = vmatprep.subr.mxu0 %v1006_v0  ;;  %p941_p9 = pnand %p940_p7, %p934_p2 }
  0x63   : > { %760 = vmatpush3.msra.mxu0 %v508_v35 }
  0x64   : > { %761 = vmatprep.subr.mxu0 %v1006_v0 }
  0x65   : > { %762 = vmatpush3.msra.mxu0 %v507_v36 }
  0x66   : > { %763 = vmatprep.subr.mxu0 %v1006_v0 }
  0x67   : > { %764 = vmatpush3.msra.mxu0 %v506_v37 }
 0x120   : > { %v377_v7 = vpop.f32.mrf.mxu0 }
 0x121   : > { %v378_v8 = vadd.f32 %v706_v6, %v377_v7 }
 0x122   : > { %v745_v9 = vpop.f32.mrf.mxu0 }
 0x123   : > { %v381_v10 = vmul.f32 %v378_v8, %v378_v8 }
 0x125   : > { %v382_v11 = vsel %vm307_vm1, %v381_v10, 0.0 }
 0x126   : > { %383 = vadd.xlane.f32.xlu0 %v382_v11 }
 0x1af   : > { %v384_v16 = vpop.xlane.xlu0 %383 }
 0x1b0   : > { %v386_v17 = vmul.f32 0.03125, %v384_v16 }
 0x1b2   : > { %v387_v18 = vadd.f32 1e-06, %v386_v17 }
 0x1b4   : > { %839 = vrsqrt.f32 %v387_v18 }
 0x1c1   : > { %v840_v19 = vpop.eup %839 }
 0x1c2   : > { %v389_v21 = vmul.f32 %v840_v19, %v378_v8 }
 0x1c4   : > { %v394_v22 = vmul.f32 %v708_v20, %v389_v21 }
 0x1c6   : > { %v709_v23 = vmul.f32 -1.442695, %v394_v22 }
 0x1c8   : > { %841 = vpow2.f32 %v709_v23 }
 0x1d5   : > { %v842_v24 = vpop.eup %841 }
 0x1d6   : > { %v398_v25 = vadd.f32 1.0, %v842_v24 }
 0x1d8   : > { %843 = vrcp.f32 %v398_v25 }
 0x1e5   : > { %v844_v26 = vpop.eup %843 }
 0x1e6   : > { %v401_v27 = vmul.f32 %v844_v26, %v394_v22 }
 0x1e8   : > { %755 = vmatmul.mubr.msk.f32.vlgmr.msra.gmra.mxu1 %vm307_vm1, %v401_v27 }
 0x2a8   : > { %v482_v29 = vpop.f32.mrf.mxu1 }
 0x2a9   : > { %v483_v30 = vadd.f32 %v710_v28, %v482_v29 }
 0x2aa   : > { %v756_v31 = vpop.f32.mrf.mxu1 }
 0x2ab   : > { %v486_v32 = vmul.f32 %v483_v30, %v483_v30 }
 0x2ad   : > { %v487_v33 = vsel %vm307_vm1, %v486_v32, 0.0 }
 0x2ae   : > { %488 = vadd.xlane.f32.xlu0 %v487_v33 }
 0x337   : > { %v489_v38 = vpop.xlane.xlu0 %488 }
 0x338   : > { %v490_v39 = vmul.f32 0.03125, %v489_v38 }
 0x33a   : > { %v491_v40 = vadd.f32 1e-06, %v490_v39 }
 0x33c   : > { %845 = vrsqrt.f32 %v491_v40 }
 0x349   : > { %v846_v41 = vpop.eup %845 }
 0x34a   : > { %v493_v43 = vmul.f32 %v846_v41, %v483_v30 }
 0x34c   : > { %v498_v44 = vmul.f32 %v712_v42, %v493_v43 }
 0x34e   : > { %v713_v45 = vmul.f32 -1.442695, %v498_v44 }
 0x350   : > { %847 = vpow2.f32 %v713_v45 }
 0x35d   : > { %v848_v46 = vpop.eup %847 }
 0x35e   : > { %v502_v47 = vadd.f32 1.0, %v848_v46 }
 0x360   : > { %849 = vrcp.f32 %v502_v47 }
 0x36d   : > { %v850_v48 = vpop.eup %849 }
 0x36e   : > { %v505_v49 = vmul.f32 %v850_v48, %v498_v44 }
 0x370   : > { %766 = vmatmul.mubr.msk.f32.vlgmr.msra.gmra.mxu0 %vm307_vm1, %v505_v49 }
 0x430   : > { %v586_v51 = vpop.f32.mrf.mxu0 }
 0x431   : > { %v587_v52 = vadd.f32 %v714_v50, %v586_v51 }
 0x432   : > { %v767_v53 = vpop.f32.mrf.mxu0 }
 0x433   : > { %590 = vst [vmem:[%s295_s14] sm:$0xff] %v587_v52 }
 0x434   : > { %944 = shalt.err (!%p941_p9)
}
 0x435   : > { %s945_s17 = scalar_lea.hbm %s1220_s29, 128  ;;  %s949_s11 = scalar_lea.hbm %s1263_s6, 256 }
 0x436   : > { %p946_p13 = scmp.ne.s32.totalorder %s1220_s29, %s945_s17  ;;  %p950_p4 = scmp.lt.s32.totalorder %s1220_s29, %s1263_s6 }
 0x437   : > { %p951_p8 = scmp.lt.s32.totalorder %s949_s11, %s945_s17 }
 0x438   : > { %p947_p5 = pnand %p946_p13, %p1281_p0 }
 0x439   : > { %p952_p3 = por %p951_p8, %p950_p4 }
 0x43a   : > { %p948_p10 = pneg %p947_p5 }
 0x43c   : > { %p953_p11 = pnand %p952_p3, %p948_p10 }
 0x43e   : > { %956 = shalt.err (!%p953_p11)
}
 0x43f   : > { %778 = dma.vmem_to_hbm [thread:$0]  (%p1281_p0), %s606_s26, 128, %s1220_s29, %s592_s13  }
 0x440 PF: > { %s617_s8 = sand.u32 1, %s987_s21   ;;  %p1282_p1 = scmp.ne.s32.totalorder %s1270_s28, 0 }
 0x441   : > { %p1283_p2 = scmp.ge.s32.totalorder %s999_s24, 2  ;;  %s618_s14 = scalar_lea.sflag [#allocation4], %s617_s8 }
 0x443   : > { %p792_p6 = pnand %p1283_p2, %p1282_p1 }
 0x445   : > { %p793_p12 = pneg %p792_p6 }
 0x447   : > { %982 = dma.done.wait (%p793_p12), %s618_s14, 128  }
 0x448   : > { %984 = vsyncadd (%p793_p12), %s618_s14, 4294967168  ;;  %p20_p7 = scmp.ge.s32.totalorder %s1116_s19, 4   ;;  %s1284_s21 = smov %s991_s22 }
 0x449   : > { %s1285_s22 = smov %s995_s23  ;;  %s1286_s23 = smov %s1132_s7 }
 0x44a   : > { %s1287_s24 = smov %s1116_s19  ;;  %22 = sbr.rel (!%p20_p7) target bundleno = 8 (0x8), region = 98 }
 0x44f   :  { %623 = vsyncpa [#allocation3], 1 }
 0x450   :  { %625 = vsyncpa [#allocation3 + $0x1], 1 }
 0x451   :  { %626 = vsyncpa [#allocation6], 1 }
 0x452   :  { %627 = vsyncpa [#allocation4], 1 }
 0x453   :  { %629 = vsyncpa [#allocation4 + $0x1], 1 }

</bundles_post_ra>
